<compile_context>
chip_gen: v7x
topology: tpu7x:2x2x1
jax: 0.10.0
libtpu: 0.0.40
codegen_flags: <defaults>
</compile_context>

<pallas_src>
import functools

import jax
import jax.numpy as jnp
from jax.experimental import pallas as pl
from jax.experimental.pallas import tpu as pltpu

PSI = 1.0
MULT = 20.0
BN_EPS = 1e-5


def _typed_image_kernel(ent_ref, rel_ref, img_ref, base_ref, w_ref, b_ref,
                        out_ref, *, b_tile, base_dim):
    """Per batch-tile math. Operand layout (feature on sublanes, batch on lanes):

        ent  = [s_t  | o_t ]      : [D,      2*BT]
        rel  = [r_ht | r_tt]      : [D,      2*BT]
        img  = [s_img| o_img]     : [IMG,    2*BT]
        base = [bs ; br ; bo]     : [3*BASE,   BT]  (stacked on sublanes)
        w' : [D, IMG]   b' : [D, 1]   out : [1, BT]  (lane-dense)
    """
    ent = ent_ref[...]
    rel = rel_ref[...]
    er = ent * rel                                                   # [D, 2*BT]

    # Folded Linear+BatchNorm projection of BOTH image slabs in one MXU matmul.
    proj = jnp.dot(w_ref[...], img_ref[...],
                   preferred_element_type=jnp.float32) + b_ref[...]  # [D, 2*BT]

    # Fused cross-sublane reductions; all results are lane-dense.
    tc = jnp.sum(er, axis=0, keepdims=True)                 # [1,2*BT] = [head_tc | tail_tc]
    img_ht = jnp.sum(proj * er, axis=0, keepdims=True)      # [1,2*BT] = [img_head | img_tail]
    s_image = proj[:, :b_tile]
    o_image = proj[:, b_tile:]
    image_image = jnp.sum(s_image * o_image, axis=0, keepdims=True)  # [1, BT]

    bpack = base_ref[...]                                            # [3*BASE, BT]
    base = jnp.sum(bpack[:base_dim]
                   * bpack[base_dim:2 * base_dim]
                   * bpack[2 * base_dim:], axis=0, keepdims=True)    # [1, BT]

    # Lane-dense sigmoids (EUP operates on full 128-lane vregs).
    base_s = jax.nn.sigmoid(PSI * base)
    tc_s = jax.nn.sigmoid(PSI * tc)
    head_tc = tc_s[:, :b_tile]
    tail_tc = tc_s[:, b_tile:]

    image_sum = img_ht[:, :b_tile] + img_ht[:, b_tile:] + image_image

    out_ref[...] = MULT * (base_s * head_tc * tail_tc + 0.005 * image_sum)


def _round_up(x, m):
    return ((x + m - 1) // m) * m


def _paired_gather_tiled(tab_a, idx_a, tab_b, idx_b, n_tiles, b_tile):
    """Gather rows of both tables and emit a TILE-MAJOR, contiguous slab.

    Returns [n_tiles, dim, 2*b_tile] where block i is [a_rows_i.T | b_rows_i.T]
    packed along lanes. Built with ONE transpose so XLA emits a single
    gather+transpose fusion per slab (no extra HBM pass).
    """
    dim = tab_a.shape[-1]
    a = tab_a[idx_a].reshape(n_tiles, 1, b_tile, dim)
    b = tab_b[idx_b].reshape(n_tiles, 1, b_tile, dim)
    pair = jnp.concatenate([a, b], axis=1)                    # [T, 2, BT, dim]
    return pair.transpose(0, 3, 1, 2).reshape(n_tiles, dim, 2 * b_tile)


def _base_pack_tiled(e_base, r_base, s_idx, r_idx, o_idx, n_tiles, b_tile):
    """Pack bs/br/bo into one tile-major slab [n_tiles, 3*BASE, b_tile]."""
    base_dim = e_base.shape[-1]
    stk = jnp.stack([e_base[s_idx], r_base[r_idx], e_base[o_idx]], axis=0)
    stk = stk.reshape(3, n_tiles, b_tile, base_dim)           # [3, T, BT, BASE]
    return stk.transpose(1, 0, 3, 2).reshape(n_tiles, 3 * base_dim, b_tile)


def typed_image_forward(s, r, o, params, *, b_tile=1024):
    """Glue: embedding gathers + BN folding + tile-major layout in XLA, math in Pallas."""
    B = s.shape[0]

    # --- batch tiling ---------------------------------------------------
    b_lanes = _round_up(max(B, 1), 128)                       # lane-dense padded batch
    b_tile = max(128, (b_tile // 128) * 128)                  # keep tiles lane-dense
    b_tile = min(b_tile, b_lanes)                             # never bigger than needed
    # Keep >= 2 tiles when the batch allows it so the ("parallel",) axis can
    # be split across both TensorCores on v7x (no-op on v5e/v6e).
    if b_lanes >= 2 * 128 and b_lanes // b_tile < 2:
        b_tile = max(128, _round_up((b_lanes + 1) // 2, 128))
    B_pad = _round_up(b_lanes, b_tile)
    n_tiles = B_pad // b_tile
    pad = B_pad - B

    # Pad with index 0 (valid row); padded columns are sliced off at the end.
    s_idx = jnp.pad(s.reshape(-1), (0, pad))
    r_idx = jnp.pad(r.reshape(-1), (0, pad))
    o_idx = jnp.pad(o.reshape(-1), (0, pad))

    D = params["E_t"].shape[-1]
    BASE = params["E_base"].shape[-1]
    IMG = params["image_embedding"].shape[-1]

    # --- glue: gathers + tile-major / paired layouts (batch on lanes) ----
    # TODO(synk): gathers stay in XLA; an in-kernel DMA row-gather would issue
    # thousands of tiny HBM DMAs per tile for these short embedding rows.
    ent_pair = _paired_gather_tiled(params["E_t"], s_idx,
                                    params["E_t"], o_idx, n_tiles, b_tile)
    rel_pair = _paired_gather_tiled(params["R_ht"], r_idx,
                                    params["R_tt"], r_idx, n_tiles, b_tile)
    img_pair = _paired_gather_tiled(params["image_embedding"], s_idx,
                                    params["image_embedding"], o_idx, n_tiles, b_tile)
    base_pack = _base_pack_tiled(params["E_base"], params["R_base"],
                                 s_idx, r_idx, o_idx, n_tiles, b_tile)

    # --- fold eval-mode BatchNorm into the Linear weight / bias ----------
    scale = params["bn_gamma"] * jax.lax.rsqrt(params["bn_var"] + BN_EPS)   # [D]
    w_fold = params["linear_w"] * scale[:, None]                            # [D, IMG]
    b_fold = ((params["linear_b"] - params["bn_mean"]) * scale
              + params["bn_beta"])[:, None]                                 # [D, 1]

    kernel = functools.partial(_typed_image_kernel, b_tile=b_tile, base_dim=BASE)

    # Explicit VMEM budget: double-buffered per-step blocks + resident weights,
    # with headroom; floor 16 MiB, cap well under v7x's 64 MiB physical VMEM.
    block_bytes = 4 * (2 * D * 2 * b_tile      # ent + rel
                       + IMG * 2 * b_tile      # img
                       + 3 * BASE * b_tile     # packed base
                       + b_tile)               # output row
    resident_bytes = 4 * (D * IMG + D)
    vmem_limit_bytes = int(min(48 << 20,
                               max(16 << 20,
                                   4 * 2 * block_bytes + 2 * resident_bytes + (2 << 20))))

    out = pl.pallas_call(
        kernel,
        out_shape=jax.ShapeDtypeStruct((1, B_pad), jnp.float32),
        grid_spec=pltpu.PrefetchScalarGridSpec(
            num_scalar_prefetch=0,
            grid=(n_tiles,),
            in_specs=[
                # Tile-major slabs: one contiguous DMA per grid step per input.
                pl.BlockSpec((pl.Squeezed(), D, 2 * b_tile),
                             lambda i: (i, 0, 0)),             # [s_t | o_t]
                pl.BlockSpec((pl.Squeezed(), D, 2 * b_tile),
                             lambda i: (i, 0, 0)),             # [r_ht | r_tt]
                pl.BlockSpec((pl.Squeezed(), IMG, 2 * b_tile),
                             lambda i: (i, 0, 0)),             # [s_img | o_img]
                pl.BlockSpec((pl.Squeezed(), 3 * BASE, b_tile),
                             lambda i: (i, 0, 0)),             # [bs ; br ; bo]
                pl.BlockSpec((D, IMG), lambda i: (0, 0)),      # folded weight (resident)
                pl.BlockSpec((D, 1), lambda i: (0, 0)),        # folded bias (resident)
            ],
            out_specs=pl.BlockSpec((1, b_tile), lambda i: (0, i)),  # lane-dense output slab
        ),
        compiler_params=pltpu.CompilerParams(
            dimension_semantics=("parallel",),
            vmem_limit_bytes=vmem_limit_bytes),
    )(ent_pair, rel_pair, img_pair, base_pack, w_fold, b_fold)

    # torch output shape for [B,1] index inputs is [B,1].
    return out[0, :B].reshape(B, 1)


def typed_image_reference(s, r, o, params):
    """Pure-JAX reference mirroring the torch forward (eval-mode BN)."""
    s_idx = s.reshape(-1); r_idx = r.reshape(-1); o_idx = o.reshape(-1)
    s_t = params["E_t"][s_idx]; o_t = params["E_t"][o_idx]
    r_ht = params["R_ht"][r_idx]; r_tt = params["R_tt"][r_idx]

    def proj_bn(x):
        y = x @ params["linear_w"].T + params["linear_b"]
        return ((y - params["bn_mean"]) / jnp.sqrt(params["bn_var"] + BN_EPS)
                * params["bn_gamma"] + params["bn_beta"])

    s_image = proj_bn(params["image_embedding"][s_idx])
    o_image = proj_bn(params["image_embedding"][o_idx])

    base = jnp.sum(params["E_base"][s_idx] * params["R_base"][r_idx]
                   * params["E_base"][o_idx], -1, keepdims=True)
    head_tc = jnp.sum(s_t * r_ht, -1, keepdims=True)
    tail_tc = jnp.sum(o_t * r_tt, -1, keepdims=True)
    base = jax.nn.sigmoid(PSI * base)
    head_tc = jax.nn.sigmoid(PSI * head_tc)
    tail_tc = jax.nn.sigmoid(PSI * tail_tc)
    image_head = jnp.sum(s_image * r_ht * s_t, -1, keepdims=True)
    image_tail = jnp.sum(o_image * r_tt * o_t, -1, keepdims=True)
    image_image = jnp.sum(o_image * s_image, -1, keepdims=True)
    return MULT * (base * head_tc * tail_tc
                   + 0.005 * (image_head + image_tail + image_image))


def make_params(key, entity_count, relation_count, embedding_dim, base_dim, img_dim):
    ks = jax.random.split(key, 8)
    f32 = jnp.float32
    return {
        # typed model embeddings: normal(0, 0.05) as in __init__
        "E_t":  0.05 * jax.random.normal(ks[0], (entity_count, embedding_dim), f32),
        "R_ht": 0.05 * jax.random.normal(ks[1], (relation_count, embedding_dim), f32),
        "R_tt": 0.05 * jax.random.normal(ks[2], (relation_count, embedding_dim), f32),
        # base (DistMult) embeddings
        "E_base": 0.05 * jax.random.normal(ks[3], (entity_count, base_dim), f32),
        "R_base": 0.05 * jax.random.normal(ks[4], (relation_count, base_dim), f32),
        # frozen image embedding table (uniform [0,1), like numpy.random.rand)
        "image_embedding": jax.random.uniform(ks[5], (entity_count, img_dim), f32),
        # nn.Linear(img_dim, embedding_dim): weight normal(0,0.05), small bias
        "linear_w": 0.05 * jax.random.normal(ks[6], (embedding_dim, img_dim), f32),
        "linear_b": 0.01 * jax.random.normal(ks[7], (embedding_dim,), f32),
        # BatchNorm1d(embedding_dim) default init (eval mode)
        "bn_gamma": jnp.ones((embedding_dim,), f32),
        "bn_beta":  jnp.zeros((embedding_dim,), f32),
        "bn_mean":  jnp.zeros((embedding_dim,), f32),
        "bn_var":   jnp.ones((embedding_dim,), f32),
    }


if __name__ == "__main__":
    entity_count, relation_count = 10, 5
    embedding_dim, base_dim, img_dim = 32, 32, 64
    B = 8

    key = jax.random.PRNGKey(0)
    kp, ks, kr, ko = jax.random.split(key, 4)
    params = make_params(kp, entity_count, relation_count, embedding_dim, base_dim, img_dim)

    s = jax.random.randint(ks, (B, 1), 0, entity_count, dtype=jnp.int32)
    r = jax.random.randint(kr, (B, 1), 0, relation_count, dtype=jnp.int32)
    o = jax.random.randint(ko, (B, 1), 0, entity_count, dtype=jnp.int32)

    out = jax.jit(typed_image_forward)(s, r, o, params)
    out = jax.block_until_ready(out)

    ref = typed_image_reference(s, r, o, params)
    assert out.shape == (B, 1), out.shape
    assert jnp.allclose(out, ref, atol=1e-4, rtol=1e-4), (out, ref)
    print("KERNEL_OK")
</pallas_src>

<mosaic_0001>
module attributes {stable_mosaic.version = 11 : i64} {
  func.func @_typed_image_kernel(%arg0: i32, %arg1: memref<1x32x256xf32, #tpu.memory_space<vmem>>, %arg2: memref<1x32x256xf32, #tpu.memory_space<vmem>>, %arg3: memref<1x64x256xf32, #tpu.memory_space<vmem>>, %arg4: memref<1x96x128xf32, #tpu.memory_space<vmem>>, %arg5: memref<32x64xf32, #tpu.memory_space<vmem>>, %arg6: memref<32x1xf32, #tpu.memory_space<vmem>>, %arg7: memref<1x128xf32, #tpu.memory_space<vmem>>) attributes {dimension_semantics = [#tpu.dimension_semantics<parallel>], iteration_bounds = array<i64: 1>, scalar_prefetch = 0 : i64, scratch_operands = 0 : i64, tpu.core_type = #tpu.core_type<tc>, window_params = [{transform_indices = @transform_0, window_bounds = array<i64: 1, 32, 256>}, {transform_indices = @transform_1, window_bounds = array<i64: 1, 32, 256>}, {transform_indices = @transform_2, window_bounds = array<i64: 1, 64, 256>}, {transform_indices = @transform_3, window_bounds = array<i64: 1, 96, 128>}, {pipeline_mode = #tpu.pipeline_mode<synchronous>, transform_indices = @transform_4, window_bounds = array<i64: 32, 64>}, {pipeline_mode = #tpu.pipeline_mode<synchronous>, transform_indices = @transform_5, window_bounds = array<i64: 32, 1>}, {transform_indices = @transform_6, window_bounds = array<i64: 1, 128>}]} {
    %c0 = arith.constant 0 : index
    %c0_0 = arith.constant 0 : index
    %c0_1 = arith.constant 0 : index
    %0 = vector.load %arg1[%c0, %c0_0, %c0_1] : memref<1x32x256xf32, #tpu.memory_space<vmem>>, vector<1x32x256xf32>
    %1 = vector.shape_cast %0 : vector<1x32x256xf32> to vector<32x256xf32>
    %c0_2 = arith.constant 0 : index
    %c0_3 = arith.constant 0 : index
    %c0_4 = arith.constant 0 : index
    %2 = vector.load %arg2[%c0_2, %c0_3, %c0_4] : memref<1x32x256xf32, #tpu.memory_space<vmem>>, vector<1x32x256xf32>
    %3 = vector.shape_cast %2 : vector<1x32x256xf32> to vector<32x256xf32>
    %4 = arith.mulf %1, %3 : vector<32x256xf32>
    %c0_5 = arith.constant 0 : index
    %c0_6 = arith.constant 0 : index
    %5 = vector.load %arg5[%c0_5, %c0_6] : memref<32x64xf32, #tpu.memory_space<vmem>>, vector<32x64xf32>
    %c0_7 = arith.constant 0 : index
    %c0_8 = arith.constant 0 : index
    %c0_9 = arith.constant 0 : index
    %6 = vector.load %arg3[%c0_7, %c0_8, %c0_9] : memref<1x64x256xf32, #tpu.memory_space<vmem>>, vector<1x64x256xf32>
    %7 = vector.shape_cast %6 : vector<1x64x256xf32> to vector<64x256xf32>
    %cst = arith.constant dense<0.000000e+00> : vector<32x256xf32>
    %8 = tpu.matmul %5, %7, %cst {dimension_numbers = #tpu.dot_dimension_numbers<[1], [0], [0], [1], [0, 0, 1, 1], [], []>} : vector<32x64xf32>, vector<64x256xf32>, vector<32x256xf32> -> vector<32x256xf32>
    %c0_10 = arith.constant 0 : index
    %c0_11 = arith.constant 0 : index
    %9 = vector.load %arg6[%c0_10, %c0_11] : memref<32x1xf32, #tpu.memory_space<vmem>>, vector<32x1xf32>
    %10 = vector.broadcast %9 : vector<32x1xf32> to vector<32x256xf32>
    %11 = arith.addf %8, %10 : vector<32x256xf32>
    %cst_12 = arith.constant dense<0.000000e+00> : vector<256xf32>
    %12 = vector.multi_reduction <add>, %4, %cst_12 [0] : vector<32x256xf32> to vector<256xf32>
    %13 = vector.shape_cast %12 : vector<256xf32> to vector<1x256xf32>
    %14 = arith.mulf %11, %4 : vector<32x256xf32>
    %cst_13 = arith.constant dense<0.000000e+00> : vector<256xf32>
    %15 = vector.multi_reduction <add>, %14, %cst_13 [0] : vector<32x256xf32> to vector<256xf32>
    %16 = vector.shape_cast %15 : vector<256xf32> to vector<1x256xf32>
    %17 = vector.extract_strided_slice %11 {offsets = [0, 0], sizes = [32, 128], strides = [1, 1]} : vector<32x256xf32> to vector<32x128xf32>
    %18 = vector.extract_strided_slice %11 {offsets = [0, 128], sizes = [32, 128], strides = [1, 1]} : vector<32x256xf32> to vector<32x128xf32>
    %19 = arith.mulf %17, %18 : vector<32x128xf32>
    %cst_14 = arith.constant dense<0.000000e+00> : vector<128xf32>
    %20 = vector.multi_reduction <add>, %19, %cst_14 [0] : vector<32x128xf32> to vector<128xf32>
    %21 = vector.shape_cast %20 : vector<128xf32> to vector<1x128xf32>
    %c0_15 = arith.constant 0 : index
    %c0_16 = arith.constant 0 : index
    %c0_17 = arith.constant 0 : index
    %22 = vector.load %arg4[%c0_15, %c0_16, %c0_17] : memref<1x96x128xf32, #tpu.memory_space<vmem>>, vector<1x96x128xf32>
    %23 = vector.shape_cast %22 : vector<1x96x128xf32> to vector<96x128xf32>
    %24 = vector.extract_strided_slice %23 {offsets = [0, 0], sizes = [32, 128], strides = [1, 1]} : vector<96x128xf32> to vector<32x128xf32>
    %25 = vector.extract_strided_slice %23 {offsets = [32, 0], sizes = [32, 128], strides = [1, 1]} : vector<96x128xf32> to vector<32x128xf32>
    %26 = arith.mulf %24, %25 : vector<32x128xf32>
    %27 = vector.extract_strided_slice %23 {offsets = [64, 0], sizes = [32, 128], strides = [1, 1]} : vector<96x128xf32> to vector<32x128xf32>
    %28 = arith.mulf %26, %27 : vector<32x128xf32>
    %cst_18 = arith.constant dense<0.000000e+00> : vector<128xf32>
    %29 = vector.multi_reduction <add>, %28, %cst_18 [0] : vector<32x128xf32> to vector<128xf32>
    %30 = vector.shape_cast %29 : vector<128xf32> to vector<1x128xf32>
    %cst_19 = arith.constant 1.000000e+00 : f32
    %31 = vector.broadcast %cst_19 : f32 to vector<1x128xf32>
    %32 = arith.mulf %31, %30 : vector<1x128xf32>
    %33 = arith.negf %32 : vector<1x128xf32>
    %34 = math.exp %33 : vector<1x128xf32>
    %cst_20 = arith.constant 1.000000e+00 : f32
    %35 = vector.broadcast %cst_20 : f32 to vector<1x128xf32>
    %36 = arith.addf %35, %34 : vector<1x128xf32>
    %37 = arith.divf %35, %36 : vector<1x128xf32>
    %cst_21 = arith.constant 1.000000e+00 : f32
    %38 = vector.broadcast %cst_21 : f32 to vector<1x256xf32>
    %39 = arith.mulf %38, %13 : vector<1x256xf32>
    %40 = arith.negf %39 : vector<1x256xf32>
    %41 = math.exp %40 : vector<1x256xf32>
    %cst_22 = arith.constant 1.000000e+00 : f32
    %42 = vector.broadcast %cst_22 : f32 to vector<1x256xf32>
    %43 = arith.addf %42, %41 : vector<1x256xf32>
    %44 = arith.divf %42, %43 : vector<1x256xf32>
    %45 = vector.extract_strided_slice %44 {offsets = [0, 0], sizes = [1, 128], strides = [1, 1]} : vector<1x256xf32> to vector<1x128xf32>
    %46 = vector.extract_strided_slice %44 {offsets = [0, 128], sizes = [1, 128], strides = [1, 1]} : vector<1x256xf32> to vector<1x128xf32>
    %47 = vector.extract_strided_slice %16 {offsets = [0, 0], sizes = [1, 128], strides = [1, 1]} : vector<1x256xf32> to vector<1x128xf32>
    %48 = vector.extract_strided_slice %16 {offsets = [0, 128], sizes = [1, 128], strides = [1, 1]} : vector<1x256xf32> to vector<1x128xf32>
    %49 = arith.addf %47, %48 : vector<1x128xf32>
    %50 = arith.addf %49, %21 : vector<1x128xf32>
    %51 = arith.mulf %37, %45 : vector<1x128xf32>
    %52 = arith.mulf %51, %46 : vector<1x128xf32>
    %cst_23 = arith.constant 5.000000e-03 : f32
    %53 = vector.broadcast %cst_23 : f32 to vector<1x128xf32>
    %54 = arith.mulf %53, %50 : vector<1x128xf32>
    %55 = arith.addf %52, %54 : vector<1x128xf32>
    %cst_24 = arith.constant 2.000000e+01 : f32
    %56 = vector.broadcast %cst_24 : f32 to vector<1x128xf32>
    %57 = arith.mulf %56, %55 : vector<1x128xf32>
    %c0_25 = arith.constant 0 : index
    %c0_26 = arith.constant 0 : index
    %58 = vector.load %arg7[%c0_25, %c0_26] : memref<1x128xf32, #tpu.memory_space<vmem>>, vector<1x128xf32>
    tpu.vector_store %arg7[%c0_25, %c0_26], %57 {strides = array<i32>} : memref<1x128xf32, #tpu.memory_space<vmem>>, vector<1x128xf32>,
    return
  }
  func.func @transform_0(%arg0: i32) -> (i32, i32, i32) {
    %c0_i32 = arith.constant 0 : i32
    %c0_i32_0 = arith.constant 0 : i32
    %c0_i32_1 = arith.constant 0 : i32
    return %arg0, %c0_i32, %c0_i32_0 : i32, i32, i32
  }
  func.func @transform_1(%arg0: i32) -> (i32, i32, i32) {
    %c0_i32 = arith.constant 0 : i32
    %c0_i32_0 = arith.constant 0 : i32
    %c0_i32_1 = arith.constant 0 : i32
    return %arg0, %c0_i32, %c0_i32_0 : i32, i32, i32
  }
  func.func @transform_2(%arg0: i32) -> (i32, i32, i32) {
    %c0_i32 = arith.constant 0 : i32
    %c0_i32_0 = arith.constant 0 : i32
    %c0_i32_1 = arith.constant 0 : i32
    return %arg0, %c0_i32, %c0_i32_0 : i32, i32, i32
  }
  func.func @transform_3(%arg0: i32) -> (i32, i32, i32) {
    %c0_i32 = arith.constant 0 : i32
    %c0_i32_0 = arith.constant 0 : i32
    %c0_i32_1 = arith.constant 0 : i32
    return %arg0, %c0_i32, %c0_i32_0 : i32, i32, i32
  }
  func.func @transform_4(%arg0: i32) -> (i32, i32) {
    %c0_i32 = arith.constant 0 : i32
    %c0_i32_0 = arith.constant 0 : i32
    %c0_i32_1 = arith.constant 0 : i32
    return %c0_i32, %c0_i32_0 : i32, i32
  }
  func.func @transform_5(%arg0: i32) -> (i32, i32) {
    %c0_i32 = arith.constant 0 : i32
    %c0_i32_0 = arith.constant 0 : i32
    %c0_i32_1 = arith.constant 0 : i32
    return %c0_i32, %c0_i32_0 : i32, i32
  }
  func.func @transform_6(%arg0: i32) -> (i32, i32) {
    %c0_i32 = arith.constant 0 : i32
    %c0_i32_0 = arith.constant 0 : i32
    return %c0_i32, %arg0 : i32, i32
  }
}

</mosaic_0001>

<bundles_post_ra>
// kernel: typed_image_forward.1
= control target key start
LH: loop header
LB: loop body
LE: loop exit
PB: predicated region body
PF: predicated region fallthrough
CT: control target
= control target key end

     0   :  { %v356_v3 = vmov 0.0   ;;  %v357_v8 = vmov 0   ;;  %vm91_vm0 = vcmask 523264   ;;  %s584_s2 = inlined_call_operand.vmem [shape: f32[1,64,256], index: 2, kind: input, shape index: {}]   ;;  %s585_s5 = inlined_call_operand.vmem [shape: f32[32,1], index: 5, kind: input, shape index: {}]   ;;  %s586_s4 = inlined_call_operand.vmem [shape: f32[32,64], index: 4, kind: input, shape index: {}]   ;;  %s587_s3 = inlined_call_operand.vmem [shape: f32[1,96,128], index: 3, kind: input, shape index: {}]   ;;  %s588_s0 = inlined_call_operand.vmem [shape: f32[1,32,256], index: 0, kind: input, shape index: {}]   ;;  %s589_s1 = inlined_call_operand.vmem [shape: f32[1,32,256], index: 1, kind: input, shape index: {}]   ;;  %s590_s6 = inlined_call_operand.vmem [shape: f32[1,128], index: 6, kind: output, shape index: {}]  }
   0x1   :  { %v52_v0 = vld [vmem:[%s584_s2 + $0x8] sm:$0xff]  ;;  %v54_v1 = vld [vmem:[%s584_s2 + $0x18] sm:$0xff]  ;;  %v51_v2 = vld [vmem:[%s584_s2] sm:$0xff]  ;;  %168 = vmatprep.mubr.f32.mxu0 %v356_v3  ;;  %180 = vmatprep.mubr.f32.mxu1 %v356_v3 }
   0x2   :  { %v316_v4 = vpack.c.bf16 %v54_v1, %v52_v0  ;;  %v53_v5 = vld [vmem:[%s584_s2 + $0x10] sm:$0xff]  ;;  %v56_v6 = vld [vmem:[%s584_s2 + $0x28] sm:$0xff]  ;;  %v58_v7 = vld [vmem:[%s584_s2 + $0x38] sm:$0xff]  ;;  %342 = vset.pattern.permute.xlu0 %v357_v8  ;;  %343 = vset.pattern.permute.xlu1 %v357_v8 }
   0x3   :  { %v318_v9 = vpack.c.bf16 %v53_v5, %v51_v2  ;;  %v320_v10 = vpack.c.bf16 %v58_v7, %v56_v6  ;;  %v55_v11 = vld [vmem:[%s584_s2 + $0x20] sm:$0xff]  ;;  %v57_v12 = vld [vmem:[%s584_s2 + $0x30] sm:$0xff]  ;;  %v60_v13 = vld [vmem:[%s584_s2 + $0x48] sm:$0xff] }
   0x4   :  { %317 = vmatprep.subr.bf16.mxu0 %v316_v4  ;;  %332 = vmatprep.subr.bf16.mxu1 %v316_v4  ;;  %v62_v14 = vld [vmem:[%s584_s2 + $0x58] sm:$0xff]  ;;  %v322_v15 = vpack.c.bf16 %v57_v12, %v55_v11  ;;  %v59_v17 = vld [vmem:[%s584_s2 + $0x40] sm:$0xff]  ;;  %v61_v18 = vld [vmem:[%s584_s2 + $0x50] sm:$0xff] }
   0x5   :  { %319 = vmatpush1.bf16.msra.mxu0 %v318_v9  ;;  %336 = vmatpush1.bf16.msra.mxu1 %v318_v9  ;;  %v324_v16 = vpack.c.bf16 %v62_v14, %v60_v13  ;;  %v64_v19 = vld [vmem:[%s584_s2 + $0x68] sm:$0xff]  ;;  %v66_v20 = vld [vmem:[%s584_s2 + $0x78] sm:$0xff]  ;;  %v67_v21 = vld [vmem:[%s585_s5] sm:$0xff]  ;;  %v326_v23 = vpack.c.bf16 %v61_v18, %v59_v17 }
   0x6   :  { %321 = vmatprep.subr.bf16.mxu0 %v320_v10  ;;  %333 = vmatprep.subr.bf16.mxu1 %v320_v10  ;;  %v69_v22 = vld [vmem:[%s585_s5 + $0x10] sm:$0xff]  ;;  %v68_v24 = vld [vmem:[%s585_s5 + $0x8] sm:$0xff]  ;;  %v328_v25 = vpack.c.bf16 %v66_v20, %v64_v19  ;;  %v63_v26 = vld [vmem:[%s584_s2 + $0x60] sm:$0xff] }
   0x7   :  { %73 = vperm.xlu0 %342, %v67_v21   ;;  %v65_v27 = vld [vmem:[%s584_s2 + $0x70] sm:$0xff]  ;;  %83 = vperm.xlu1 %343, %v69_v22   ;;  %v70_v28 = vld [vmem:[%s585_s5 + $0x18] sm:$0xff]  ;;  %v47_v30 = vld [vmem:[%s586_s4] sm:$0xff] }
   0x8   :  { %v330_v29 = vpack.c.bf16 %v65_v27, %v63_v26  ;;  %v49_v31 = vld [vmem:[%s586_s4 + $0x10] sm:$0xff]  ;;  %v48_v32 = vld [vmem:[%s586_s4 + $0x8] sm:$0xff]  ;;  %v50_v33 = vld [vmem:[%s586_s4 + $0x18] sm:$0xff] }
   0x9   :  { %323 = vmatpush1.bf16.msra.mxu0 %v322_v15  ;;  %337 = vmatpush1.bf16.msra.mxu1 %v322_v15  ;;  %v250_v34 = vld [vmem:[%s587_s3] sm:$0xff]  ;;  %v251_v35 = vld [vmem:[%s587_s3 + $0x8] sm:$0xff]  ;;  %v25_v40 = vld [vmem:[%s588_s0 + $0x10] sm:$0xff] }
   0xa   :  { %325 = vmatprep.subr.bf16.mxu0 %v324_v16  ;;  %334 = vmatprep.subr.bf16.mxu1 %v324_v16  ;;  %v254_v36 = vld [vmem:[%s587_s3 + $0x20] sm:$0xff]  ;;  %v255_v37 = vld [vmem:[%s587_s3 + $0x28] sm:$0xff]  ;;  %v33_v41 = vld [vmem:[%s589_s1 + $0x10] sm:$0xff] }
   0xb   :  { %78 = vperm.xlu0 %342, %v68_v24   ;;  %88 = vperm.xlu1 %343, %v70_v28   ;;  %v23_v38 = vld [vmem:[%s588_s0] sm:$0xff]  ;;  %v252_v42 = vld [vmem:[%s587_s3 + $0x10] sm:$0xff]  ;;  %v262_v43 = vmul.f32 %v254_v36, %v250_v34  ;;  %v263_v44 = vmul.f32 %v255_v37, %v251_v35  ;;  %v259_v47 = vld [vmem:[%s587_s3 + $0x48] sm:$0xff]  ;;  %v503_v49 = vmul.f32 %v33_v41, %v25_v40 }
   0xc   :  { %v31_v39 = vld [vmem:[%s589_s1] sm:$0xff]  ;;  %v256_v45 = vld [vmem:[%s587_s3 + $0x30] sm:$0xff]  ;;  %v24_v50 = vld [vmem:[%s588_s0 + $0x8] sm:$0xff] }
   0xd   :  { %327 = vmatpush1.bf16.msra.mxu0 %v326_v23  ;;  %338 = vmatpush1.bf16.msra.mxu1 %v326_v23  ;;  %v258_v46 = vld [vmem:[%s587_s3 + $0x40] sm:$0xff]  ;;  %v501_v48 = vmul.f32 %v31_v39, %v23_v38  ;;  %v32_v53 = vld [vmem:[%s589_s1 + $0x8] sm:$0xff]  ;;  %v26_v54 = vld [vmem:[%s588_s0 + $0x18] sm:$0xff]  ;;  %v264_v56 = vmul.f32 %v256_v45, %v252_v42  ;;  %v267_v58 = vmul.f32 %v263_v44, %v259_v47 }
   0xe   :  { %329 = vmatprep.subr.bf16.mxu0 %v328_v25  ;;  %335 = vmatprep.subr.bf16.mxu1 %v328_v25  ;;  %v27_v51 = vld [vmem:[%s588_s0 + $0x20] sm:$0xff]  ;;  %v34_v55 = vld [vmem:[%s589_s1 + $0x18] sm:$0xff]  ;;  %v266_v57 = vmul.f32 %v262_v43, %v258_v46  ;;  %v260_v61 = vld [vmem:[%s587_s3 + $0x50] sm:$0xff]  ;;  %v536_v0 = vmul.f32 %v32_v53, %v24_v50 }
   0xf   :  { %v35_v52 = vld [vmem:[%s589_s1 + $0x20] sm:$0xff]  ;;  %v253_v59 = vld [vmem:[%s587_s3 + $0x18] sm:$0xff]  ;;  %v193_v63 = vadd.f32 %v503_v49, %v501_v48  ;;  %v29_v1 = vld [vmem:[%s588_s0 + $0x30] sm:$0xff]  ;;  %v268_v5 = vmul.f32 %v264_v56, %v260_v61 }
  0x10   :  { %v257_v60 = vld [vmem:[%s587_s3 + $0x38] sm:$0xff]  ;;  %v532_v62 = vmul.f32 %v35_v52, %v27_v51  ;;  %v37_v2 = vld [vmem:[%s589_s1 + $0x30] sm:$0xff]  ;;  %v270_v6 = vadd.f32 %v267_v58, %v266_v57  ;;  %v28_v7 = vld [vmem:[%s588_s0 + $0x28] sm:$0xff] }
  0x11   :  { %331 = vmatpush1.bf16.msra.mxu0 %v330_v29  ;;  %339 = vmatpush1.bf16.msra.mxu1 %v330_v29  ;;  %v265_v4 = vmul.f32 %v257_v60, %v253_v59  ;;  %v36_v8 = vld [vmem:[%s589_s1 + $0x28] sm:$0xff]  ;;  %v261_v9 = vld [vmem:[%s587_s3 + $0x58] sm:$0xff]  ;;  %v555_v10 = vmul.f32 %v37_v2, %v29_v1 }
  0x12   :  { %v194_v11 = vadd.f32 %v193_v63, %v532_v62  ;;  %v558_v12 = vmul.f32 %v36_v8, %v28_v7  ;;  %v271_v15 = vadd.f32 %v270_v6, %v268_v5  ;;  %v30_v16 = vld [vmem:[%s588_s0 + $0x38] sm:$0xff] }
  0x13   :  { %v269_v14 = vmul.f32 %v265_v4, %v261_v9  ;;  %v38_v17 = vld [vmem:[%s589_s1 + $0x38] sm:$0xff] }
  0x14   :  { %309 = vmatmul.mubr.msk.f32.vlgmr.msra.gmra.mrb[0].mxu0 %vm91_vm0, %v47_v30  ;;  %311 = vmatmul.mubr.msk.f32.vlgmr.msra.gmra.mrb[0].mxu1 %vm91_vm0, %v49_v31  ;;  %v195_v18 = vadd.f32 %v194_v11, %v555_v10  ;;  %v569_v19 = vmul.f32 %v38_v17, %v30_v16 }
  0x15   :  { %174 = vmatprep.mubr.f32.mxu0 %v356_v3  ;;  %186 = vmatprep.mubr.f32.mxu1 %v356_v3  ;;  %v544_v3 = vmul.f32 %v34_v55, %v26_v54  ;;  %v272_v21 = vadd.f32 %v271_v15, %v269_v14 }
  0x16   :  { %v196_v22 = vrot.slane %v195_v18, 4 }
  0x17   :  { %v202_v13 = vadd.f32 %v544_v3, %v536_v0  ;;  %v273_v24 = vrot.slane %v272_v21, 4 }
  0x18   :  { %310 = vmatmul.mubr.msk.f32.gmra.mrb[2].mxu0 %vm91_vm0, %v48_v32  ;;  %312 = vmatmul.mubr.msk.f32.gmra.mrb[2].mxu1 %vm91_vm0, %v50_v33  ;;  %v197_v25 = vadd.f32 %v196_v22, %v195_v18 }
  0x19   :  { %v203_v20 = vadd.f32 %v202_v13, %v558_v12  ;;  %v274_v27 = vadd.f32 %v273_v24, %v272_v21 }
  0x1a   :  { %v198_v28 = vrot.slane %v197_v25, 2 }
  0x1b   :  { %v204_v23 = vadd.f32 %v203_v20, %v569_v19  ;;  %v275_v30 = vrot.slane %v274_v27, 2 }
  0x1c   :  { %v199_v31 = vadd.f32 %v198_v28, %v197_v25 }
  0x1d   :  { %v205_v26 = vrot.slane %v204_v23, 4  ;;  %v276_v33 = vadd.f32 %v275_v30, %v274_v27 }
  0x1e   :  { %v200_v34 = vrot.slane %v199_v31, 1 }
  0x1f   :  { %v206_v29 = vadd.f32 %v205_v26, %v204_v23  ;;  %v277_v36 = vrot.slane %v276_v33, 1 }
  0x20   :  { %v201_v37 = vadd.f32 %v200_v34, %v199_v31 }
  0x21   :  { %v207_v32 = vrot.slane %v206_v29, 2  ;;  %v278_v39 = vadd.f32 %v277_v36, %v276_v33 }
  0x22   :  { %v314_v40 = vmul.f32 -1.442695, %v201_v37 }
  0x23   :  { %v208_v35 = vadd.f32 %v207_v32, %v206_v29  ;;  %v313_v42 = vmul.f32 -1.442695, %v278_v39 }
  0x24   :  { %344 = vpow2.f32 %v314_v40 }
  0x25   :  { %v209_v38 = vrot.slane %v208_v35, 1  ;;  %346 = vpow2.f32 %v313_v42 }
  0x27   :  { %v210_v41 = vadd.f32 %v209_v38, %v208_v35 }
  0x29   :  { %v315_v44 = vmul.f32 -1.442695, %v210_v41 }
  0x2b   :  { %348 = vpow2.f32 %v315_v44 }
  0x2e   :  { %v345_v58 = vpop.eup %344 }
  0x2f   :  { %v347_v6 = vpop.eup %346  ;;  %v291_v13 = vadd.f32 1.0, %v345_v58 }
  0x30   :  { %v282_v21 = vadd.f32 1.0, %v347_v6 }
  0x31   :  { %350 = vrcp.f32 %v291_v13 }
  0x32   :  { %352 = vrcp.f32 %v282_v21 }
  0x35   :  { %v349_v22 = vpop.eup %348 }
  0x36   :  { %v292_v28 = vadd.f32 1.0, %v349_v22 }
  0x38   :  { %354 = vrcp.f32 %v292_v28 }
  0x3b   :  { %v351_v38 = vpop.eup %350 }
  0x3c   :  { %v353_v40 = vpop.eup %352 }
  0x86   :  { %v84_v43 = vpop.permute.xlu1 %83  ;;  %v74_v45 = vpop.permute.xlu0 %73 }
  0x8a   :  { %v89_v56 = vpop.permute.xlu1 %88  ;;  %v79_v57 = vpop.permute.xlu0 %78 }
  0xe7   :  { %v170_v46 = vpop.f32.mrb[0].mxu0  ;;  %v182_v47 = vpop.f32.mrb[0].mxu1 }
  0xe8   :  { %v171_v50 = vadd.f32 %v170_v46, %v74_v45  ;;  %v172_v51 = vpop.f32.mrb[1].mxu0  ;;  %v183_v52 = vadd.f32 %v182_v47, %v84_v43  ;;  %v184_v53 = vpop.f32.mrb[1].mxu1  ;;  %v299_v46 = vmul.f32 %v353_v40, %v351_v38 }
  0xe9   :  { %v173_v54 = vadd.f32 %v172_v51, %v74_v45  ;;  %v185_v55 = vadd.f32 %v184_v53, %v84_v43  ;;  %v355_v47 = vpop.eup %354 }
  0xea   :  { %v211_v9 = vmul.f32 %v171_v50, %v501_v48  ;;  %v215_v18 = vmul.f32 %v183_v52, %v532_v62  ;;  %v300_v53 = vmul.f32 %v355_v47, %v299_v46 }
  0xeb   :  { %v237_v59 = vmul.f32 %v173_v54, %v171_v50  ;;  %v239_v60 = vmul.f32 %v185_v55, %v183_v52  ;;  %v176_v61 = vpop.f32.mrb[2].mxu0  ;;  %v188_v63 = vpop.f32.mrb[2].mxu1  ;;  %v212_v14 = vmul.f32 %v173_v54, %v536_v0  ;;  %v216_v23 = vmul.f32 %v185_v55, %v558_v12 }
  0xec   :  { %v177_v1 = vadd.f32 %v176_v61, %v79_v57  ;;  %v189_v2 = vadd.f32 %v188_v63, %v89_v56  ;;  %v178_v4 = vpop.f32.mrb[3].mxu0  ;;  %v190_v5 = vpop.f32.mrb[3].mxu1 }
  0xed   :  { %v179_v7 = vadd.f32 %v178_v4, %v79_v57  ;;  %v191_v8 = vadd.f32 %v190_v5, %v89_v56 }
  0xee   :  { %v213_v11 = vmul.f32 %v177_v1, %v503_v49  ;;  %v217_v48 = vmul.f32 %v189_v2, %v555_v10 }
  0xef   :  { %v214_v15 = vmul.f32 %v179_v7, %v544_v3  ;;  %v238_v16 = vmul.f32 %v179_v7, %v177_v1  ;;  %v240_v17 = vmul.f32 %v191_v8, %v189_v2  ;;  %v218_v49 = vmul.f32 %v191_v8, %v569_v19 }
  0xf0   :  { %v219_v20 = vadd.f32 %v213_v11, %v211_v9 }
  0xf1   :  { %v228_v24 = vadd.f32 %v214_v15, %v212_v14  ;;  %v241_v25 = vadd.f32 %v238_v16, %v237_v59 }
  0xf2   :  { %v220_v26 = vadd.f32 %v219_v20, %v215_v18 }
  0xf3   :  { %v229_v0 = vadd.f32 %v228_v24, %v216_v23  ;;  %v242_v27 = vadd.f32 %v241_v25, %v239_v60 }
  0xf4   :  { %v221_v3 = vadd.f32 %v220_v26, %v217_v48 }
  0xf5   :  { %v230_v29 = vadd.f32 %v229_v0, %v218_v49  ;;  %v243_v62 = vadd.f32 %v242_v27, %v240_v17 }
  0xf6   :  { %v222_v30 = vrot.slane %v221_v3, 4 }
  0xf7   :  { %v231_v31 = vrot.slane %v230_v29, 4  ;;  %v244_v32 = vrot.slane %v243_v62, 4 }
  0xf8   :  { %v223_v33 = vadd.f32 %v222_v30, %v221_v3 }
  0xf9   :  { %v232_v12 = vadd.f32 %v231_v31, %v230_v29  ;;  %v245_v34 = vadd.f32 %v244_v32, %v243_v62 }
  0xfa   :  { %v224_v35 = vrot.slane %v223_v33, 2 }
  0xfb   :  { %v233_v10 = vrot.slane %v232_v12, 2  ;;  %v246_v36 = vrot.slane %v245_v34, 2 }
  0xfc   :  { %v225_v37 = vadd.f32 %v224_v35, %v223_v33 }
  0xfd   :  { %v234_v19 = vadd.f32 %v233_v10, %v232_v12  ;;  %v247_v39 = vadd.f32 %v246_v36, %v245_v34 }
  0xfe   :  { %v226_v41 = vrot.slane %v225_v37, 1 }
  0xff   :  { %v235_v42 = vrot.slane %v234_v19, 1  ;;  %v248_v43 = vrot.slane %v247_v39, 1 }
 0x100   :  { %v227_v44 = vadd.f32 %v226_v41, %v225_v37 }
 0x101   :  { %v236_v45 = vadd.f32 %v235_v42, %v234_v19  ;;  %v249_v50 = vadd.f32 %v248_v43, %v247_v39 }
 0x103   :  { %v297_v51 = vadd.f32 %v236_v45, %v227_v44 }
 0x105   :  { %v298_v52 = vadd.f32 %v297_v51, %v249_v50 }
 0x107   :  { %v301_v54 = vmul.f32 0.005, %v298_v52 }
 0x109   :  { %v302_v55 = vadd.f32 %v301_v54, %v300_v53 }
 0x10b   :  { %v303_v56 = vmul.f32 20.0, %v302_v55 }
 0x10d   :  { %304 = vst [vmem:[%s590_s6] sm:$0x1] %v303_v56 }

</bundles_post_ra>
